<compile_context>
chip_gen: v7x
topology: tpu7x:2x2x1
jax: 0.10.0
libtpu: 0.0.40
codegen_flags: <defaults>
</compile_context>

<pallas_src>
import math

import jax
import jax.numpy as jnp
from jax import lax
from jax.experimental import pallas as pl
from jax.experimental.pallas import tpu as pltpu


def _stem_kernel(x_ref, w_ref, b_ref, o_ref):
    # x_ref: (Bt, 4, TL)  x[b, j, s] = input sample 4*s + j (lane-dense in s)
    # w_ref: (4, 4)       fused weight  w[c, j]
    # b_ref: (4, 1)       fused bias
    # o_ref: (Bt, 4, TL)  out[b, c, s]  (NCL block, lane-dense stores)
    w = w_ref[...]
    b = b_ref[...]
    # The 4->4 channel map runs on the MXU (vector-extended slot, idle in this
    # HBM-bound kernel) instead of a VPU broadcast-FMA chain, which was the
    # binding slot on v7x.  f32 accumulate keeps the 1e-5 tolerance.
    for bi in range(x_ref.shape[0]):              # static unroll over batch rows
        x = x_ref[bi]                             # (4, TL)
        y = jnp.dot(w, x, preferred_element_type=jnp.float32) + b
        o_ref[bi] = y.astype(o_ref.dtype)


# Bt*TL cap: 256K output positions -> 4 MiB f32 per (Bt, 4, TL) block, i.e.
# ~4 MiB in + 4 MiB out per grid step, 16 MiB with double buffering.
_BLOCK_ELEMS_CAP = 256 * 1024


def _vmem_capacity_bytes():
    """Physical VMEM of the attached TPU (conservative fallback if unknown)."""
    try:
        info = pltpu.get_tpu_info()
        for name in ("vmem_capacity_bytes", "vmem_size_bytes", "vmem_bytes"):
            v = getattr(info, name, None)
            if v:
                return int(v)
    except Exception:
        pass
    return 64 << 20          # v7x-sized fallback (smallest current generation)


def _choose_tiling(n, l2, block_elems):
    """Pick (Bt, TL): batch rows and output positions per block.

    Blocks are either full-extent along a dim or a multiple of 128 lanes, so
    non-power-of-two / ragged lengths never collapse to tiny tiles (cdiv grid
    handles the partial last block), and small-L2 / large-N inputs fold
    several batch rows into one block to keep >= MiB-scale DMA per step.
    """
    if l2 <= block_elems:
        tl = l2                                           # full length per block
        bt = max(1, min(n, block_elems // max(l2, 1)))    # fold batch rows
    else:
        tl = min(l2, max(128, (block_elems // 128) * 128))  # 128-lane aligned
        bt = 1
    return bt, tl


def _fuse_params(params):
    """Compose the two convs into one (4 samples -> 4 channels) linear map."""
    w1, b1 = params["w1"], params["b1"]            # (2,1,2), (2,)
    w2, b2 = params["w2"], params["b2"]            # (4,2,2), (4,)
    w1s = w1[:, 0, :]                              # (c1, k1)
    # Wf[c2, 2*k2 + k1] = sum_c1 w2[c2, c1, k2] * w1[c1, 0, k1]
    wf = jnp.einsum("ock,ci->oki", w2, w1s).reshape(4, 4)
    bf = b2 + jnp.einsum("ock,c->o", w2, b1)       # (4,)
    return wf, bf.reshape(4, 1)


def convstem_forward(x, params, block_elems=_BLOCK_ELEMS_CAP):
    """x: (N, 1, L) NCL float32, L % 4 == 0. Returns (N, 4, L//4) NCL."""
    n, c, l = x.shape
    assert c == 1 and l % 4 == 0
    l2 = l // 4

    wf, bf = _fuse_params(params)                  # (4, 4), (4, 1)

    # Deinterleave so the output-position axis is lane-dense in the kernel:
    # xt[n, j, s] = x[n, 0, 4*s + j].
    # TODO(synk): this stride-4 deinterleave is one XLA transpose (an extra
    # input-sized HBM round trip); an in-kernel lane deinterleave (XLU
    # shuffles) has no clean/robust jnp-level lowering on Mosaic today, so we
    # keep the explicit transpose and additionally allow XLA to fuse it into
    # the pallas_call input below (allow_input_fusion) when it can.
    xt = jnp.swapaxes(x.reshape(n, l2, 4), 1, 2)   # (N, 4, L2)

    bt, tl = _choose_tiling(n, l2, block_elems)
    grid = (pl.cdiv(n, bt), pl.cdiv(l2, tl))

    # Raise the scoped-VMEM limit generation-aware (half of physical): the
    # double-buffered ~16 MiB pipelined footprint then fits on v5e (16 MiB
    # scoped default, 128 MiB physical) as well as v6e/v7x, with headroom
    # left for compiler scratch and in-kernel temporaries.
    vmem_limit = _vmem_capacity_bytes() // 2

    return pl.pallas_call(
        _stem_kernel,
        out_shape=jax.ShapeDtypeStruct((n, 4, l2), x.dtype),
        grid=grid,
        in_specs=[
            pl.BlockSpec((bt, 4, tl), lambda b, i: (b, 0, i)),   # streamed input
            pl.BlockSpec((4, 4), lambda b, i: (0, 0)),           # fused weight
            pl.BlockSpec((4, 1), lambda b, i: (0, 0)),           # fused bias
        ],
        out_specs=pl.BlockSpec((bt, 4, tl), lambda b, i: (b, 0, i)),
        compiler_params=pltpu.CompilerParams(
            dimension_semantics=("parallel", "parallel"),
            allow_input_fusion=[True, False, False],   # fuse the transpose if legal
            vmem_limit_bytes=vmem_limit,
        ),
        cost_estimate=pl.CostEstimate(
            flops=8 * n * l,                   # 4 MACs per output element
            transcendentals=0,
            bytes_accessed=8 * n * l + 80),    # read xt + write out (+ w, b)
    )(xt, wf, bf)


def init_params(key):
    """Deterministic synthetic params matching PyTorch Conv1d shapes/init."""
    k1, k2, k3, k4 = jax.random.split(key, 4)
    # conv1: Conv1d(1, 2, 2, 2) -> weight (2,1,2), bias (2,)
    bound1 = 1.0 / math.sqrt(1 * 2)
    w1 = jax.random.uniform(k1, (2, 1, 2), jnp.float32, -bound1, bound1)
    b1 = jax.random.uniform(k2, (2,), jnp.float32, -bound1, bound1)
    # conv2: Conv1d(2, 4, 2, 2) -> weight (4,2,2), bias (4,)
    bound2 = 1.0 / math.sqrt(2 * 2)
    w2 = jax.random.uniform(k3, (4, 2, 2), jnp.float32, -bound2, bound2)
    b2 = jax.random.uniform(k4, (4,), jnp.float32, -bound2, bound2)
    return {"w1": w1, "b1": b1, "w2": w2, "b2": b2}


def _reference(x, params):
    """Pure-JAX reference using lax convolutions (PyTorch semantics)."""
    h = lax.conv_general_dilated(
        x, params["w1"], window_strides=(2,), padding="VALID",
        dimension_numbers=("NCH", "OIH", "NCH"))
    h = h + params["b1"][None, :, None]
    o = lax.conv_general_dilated(
        h, params["w2"], window_strides=(2,), padding="VALID",
        dimension_numbers=("NCH", "OIH", "NCH"))
    return o + params["b2"][None, :, None]


if __name__ == "__main__":
    key = jax.random.PRNGKey(0)
    kx1, kx2, kx3, kp = jax.random.split(key, 4)
    params = init_params(kp)

    fwd = jax.jit(convstem_forward)

    # 1) tiny shape (sub-128-lane masked-store path): (2, 1, 16) -> (2, 4, 4)
    x1 = jax.random.normal(kx1, (2, 1, 16), dtype=jnp.float32)
    o1 = jax.block_until_ready(fwd(x1, params))
    r1 = _reference(x1, params)
    assert o1.shape == r1.shape == (2, 4, 4)
    assert jnp.allclose(o1, r1, atol=1e-5, rtol=1e-5)

    # 2) lane-dense path: L2 = 256 (multiple of 128), batch rows folded into
    #    a single block (Bt = 3).
    x2 = jax.random.normal(kx2, (3, 1, 4 * 256), dtype=jnp.float32)
    o2 = jax.block_until_ready(fwd(x2, params))
    r2 = _reference(x2, params)
    assert o2.shape == r2.shape == (3, 4, 256)
    assert jnp.allclose(o2, r2, atol=1e-5, rtol=1e-5)

    # 3) ragged multi-step grid: force small blocks so L2 = 800 is split into
    #    128-lane-aligned blocks with a partial last block.
    x3 = jax.random.normal(kx3, (2, 1, 4 * 800), dtype=jnp.float32)
    o3 = jax.block_until_ready(
        jax.jit(lambda a: convstem_forward(a, params, block_elems=256))(x3))
    r3 = _reference(x3, params)
    assert o3.shape == r3.shape == (2, 4, 800)
    assert jnp.allclose(o3, r3, atol=1e-5, rtol=1e-5)

    print("KERNEL_OK")
</pallas_src>

<mosaic_0001>
module attributes {stable_mosaic.version = 11 : i64} {
  func.func @_stem_kernel(%arg0: i32, %arg1: i32, %arg2: memref<2x4x4xf32, #tpu.memory_space<vmem>>, %arg3: memref<4x4xf32, #tpu.memory_space<vmem>>, %arg4: memref<4x1xf32, #tpu.memory_space<vmem>>, %arg5: memref<2x4x4xf32, #tpu.memory_space<vmem>>) attributes {dimension_semantics = [#tpu.dimension_semantics<parallel>, #tpu.dimension_semantics<parallel>], iteration_bounds = array<i64: 1, 1>, scalar_prefetch = 0 : i64, scratch_operands = 0 : i64, tpu.core_type = #tpu.core_type<tc>, window_params = [{transform_indices = @transform_0, window_bounds = array<i64: 2, 4, 4>}, {pipeline_mode = #tpu.pipeline_mode<synchronous>, transform_indices = @transform_1, window_bounds = array<i64: 4, 4>}, {pipeline_mode = #tpu.pipeline_mode<synchronous>, transform_indices = @transform_2, window_bounds = array<i64: 4, 1>}, {transform_indices = @transform_3, window_bounds = array<i64: 2, 4, 4>}]} {
    %c0 = arith.constant 0 : index
    %c0_0 = arith.constant 0 : index
    %0 = vector.load %arg3[%c0, %c0_0] : memref<4x4xf32, #tpu.memory_space<vmem>>, vector<4x4xf32>
    %c0_1 = arith.constant 0 : index
    %c0_2 = arith.constant 0 : index
    %1 = vector.load %arg4[%c0_1, %c0_2] : memref<4x1xf32, #tpu.memory_space<vmem>>, vector<4x1xf32>
    %c0_3 = arith.constant 0 : index
    %c0_4 = arith.constant 0 : index
    %c0_5 = arith.constant 0 : index
    %2 = vector.load %arg2[%c0_3, %c0_4, %c0_5] : memref<2x4x4xf32, #tpu.memory_space<vmem>>, vector<1x4x4xf32>
    %3 = vector.shape_cast %2 : vector<1x4x4xf32> to vector<4x4xf32>
    %cst = arith.constant dense<0.000000e+00> : vector<4x4xf32>
    %4 = tpu.matmul %0, %3, %cst {dimension_numbers = #tpu.dot_dimension_numbers<[1], [0], [0], [1], [0, 0, 1, 1], [], []>} : vector<4x4xf32>, vector<4x4xf32>, vector<4x4xf32> -> vector<4x4xf32>
    %5 = vector.broadcast %1 : vector<4x1xf32> to vector<4x4xf32>
    %6 = arith.addf %4, %5 : vector<4x4xf32>
    %c0_6 = arith.constant 0 : index
    %c0_7 = arith.constant 0 : index
    %c0_8 = arith.constant 0 : index
    %7 = vector.load %arg5[%c0_6, %c0_7, %c0_8] : memref<2x4x4xf32, #tpu.memory_space<vmem>>, vector<1x4x4xf32>
    %8 = vector.shape_cast %7 : vector<1x4x4xf32> to vector<4x4xf32>
    %9 = vector.shape_cast %6 : vector<4x4xf32> to vector<1x4x4xf32>
    tpu.vector_store %arg5[%c0_6, %c0_7, %c0_8], %9 {strides = array<i32>} : memref<2x4x4xf32, #tpu.memory_space<vmem>>, vector<1x4x4xf32>,
    %c1 = arith.constant 1 : index
    %c0_9 = arith.constant 0 : index
    %c0_10 = arith.constant 0 : index
    %10 = vector.load %arg2[%c1, %c0_9, %c0_10] : memref<2x4x4xf32, #tpu.memory_space<vmem>>, vector<1x4x4xf32>
    %11 = vector.shape_cast %10 : vector<1x4x4xf32> to vector<4x4xf32>
    %cst_11 = arith.constant dense<0.000000e+00> : vector<4x4xf32>
    %12 = tpu.matmul %0, %11, %cst_11 {dimension_numbers = #tpu.dot_dimension_numbers<[1], [0], [0], [1], [0, 0, 1, 1], [], []>} : vector<4x4xf32>, vector<4x4xf32>, vector<4x4xf32> -> vector<4x4xf32>
    %13 = vector.broadcast %1 : vector<4x1xf32> to vector<4x4xf32>
    %14 = arith.addf %12, %13 : vector<4x4xf32>
    %c1_12 = arith.constant 1 : index
    %c0_13 = arith.constant 0 : index
    %c0_14 = arith.constant 0 : index
    %15 = vector.load %arg5[%c1_12, %c0_13, %c0_14] : memref<2x4x4xf32, #tpu.memory_space<vmem>>, vector<1x4x4xf32>
    %16 = vector.shape_cast %15 : vector<1x4x4xf32> to vector<4x4xf32>
    %17 = vector.shape_cast %14 : vector<4x4xf32> to vector<1x4x4xf32>
    tpu.vector_store %arg5[%c1_12, %c0_13, %c0_14], %17 {strides = array<i32>} : memref<2x4x4xf32, #tpu.memory_space<vmem>>, vector<1x4x4xf32>,
    return
  }
  func.func @transform_0(%arg0: i32, %arg1: i32) -> (i32, i32, i32) {
    %c0_i32 = arith.constant 0 : i32
    %c0_i32_0 = arith.constant 0 : i32
    return %arg0, %c0_i32, %arg1 : i32, i32, i32
  }
  func.func @transform_1(%arg0: i32, %arg1: i32) -> (i32, i32) {
    %c0_i32 = arith.constant 0 : i32
    %c0_i32_0 = arith.constant 0 : i32
    %c0_i32_1 = arith.constant 0 : i32
    return %c0_i32, %c0_i32_0 : i32, i32
  }
  func.func @transform_2(%arg0: i32, %arg1: i32) -> (i32, i32) {
    %c0_i32 = arith.constant 0 : i32
    %c0_i32_0 = arith.constant 0 : i32
    %c0_i32_1 = arith.constant 0 : i32
    return %c0_i32, %c0_i32_0 : i32, i32
  }
  func.func @transform_3(%arg0: i32, %arg1: i32) -> (i32, i32, i32) {
    %c0_i32 = arith.constant 0 : i32
    %c0_i32_0 = arith.constant 0 : i32
    return %arg0, %c0_i32, %arg1 : i32, i32, i32
  }
}

</mosaic_0001>

<bundles_post_ra>
// kernel: convstem_forward.2
= control target key start
LH: loop header
LB: loop body
LE: loop exit
PB: predicated region body
PF: predicated region fallthrough
CT: control target
= control target key end

     0   :  { %v254_v1 = vmov 0.0   ;;  %s301_s0 = inlined_call_operand.vmem [shape: f32[4,4], index: 0, kind: input, shape index: {}]   ;;  %s302_s1 = inlined_call_operand.vmem [shape: f32[4,1], index: 1, kind: input, shape index: {}]   ;;  %s303_s2 = inlined_call_operand.vmem [shape: f32[2,4,4], index: 2, kind: input, shape index: {}]   ;;  %s304_s3 = inlined_call_operand.hbm [shape: f32[2,4,4], index: 3, kind: output, shape index: {}]  }
   0x1   :  { %v15_v0 = vld [vmem:[%s303_s2] sm:$0xff]   ;;  %213 = vmatprep.subr.mxu0 %v254_v1  ;;  %218 = vmatprep.subr.mxu1 %v254_v1 }
   0x2   :  { %17 = vst [vmem:[#allocation4] sm:$0xff] %v15_v0   ;;  %v24_v2 = vld [vmem:[%s302_s1] sm:$0xf] }
   0x3   :  { %8 = vsyncpa [#allocation3], 0  ;;  %vm255_vm0 = vmmov 0   ;;  %v256_v3 = vmov 0   ;;  %vm35_vm1 = vcmask 1043456   ;;  %vm31_vm2 = vcmask 31744  }
   0x4   :  { %215 = vmatprep.mubr.msk.f32.mxu0 %vm255_vm0, %v254_v1  ;;  %220 = vmatprep.mubr.msk.f32.mxu1 %vm255_vm0, %v254_v1  ;;  %v23_v4 = vld [vmem:[%s301_s0] sm:$0xf]  ;;  %s257_s1 = smov [#allocation2]   ;;  %vm109_vm3 = vcmask 27648  }
   0x5   :  { %229 = vset.pattern.permute.xlu0 %v256_v3  ;;  %s193_s2 = sshll.u32 %s257_s1, 4  ;;  %s194_s2 = int_to_ptr.vmem [resolvable:$true] %s193_s2 }
   0x6   :  { %28 = vperm.xlu0 %229, %v24_v2   ;;  %s230_s0 = scalar_lea.vmem %s194_s2, 128  ;;  %p235_p1 = scmp.lt.s32.totalorder %s194_s2, %s194_s2 }
   0x7   :  { %p231_p0 = scmp.ne.s32.totalorder %s194_s2, %s230_s0  ;;  %p236_p2 = scmp.lt.s32.totalorder %s230_s0, %s230_s0 }
   0x9   :  { %v25_v5 = vld [vmem:[#allocation4] sm:$0xf]  ;;  %v112_v6 = vld [vmem:[#allocation4 + $0x4] sm:$0xf]  ;;  %p237_p3 = por %p236_p2, %p235_p1 }
   0xa   :  { %214 = vmatpush3.msk.msra.mxu0 %vm35_vm1, %v25_v5  ;;  %219 = vmatpush3.msk.msra.mxu1 %vm35_vm1, %v112_v6 }
   0xb   :  { %216 = vmatmul.mubr.msk.f32.vlgmr.msra.gmra.mrb[0].mxu0 %vm31_vm2, %v23_v4  ;;  %221 = vmatmul.mubr.msk.f32.vlgmr.msra.gmra.mrb[0].mxu1 %vm31_vm2, %v23_v4  ;;  %p238_p4 = pnand %p237_p3, %p231_p0 }
  0x85   :  { %v29_v7 = vpop.permute.xlu0 %28 }
  0xde   :  { %v105_v8 = vpop.f32.mrb[0].mxu0  ;;  %v182_v9 = vpop.f32.mrb[0].mxu1 }
  0xdf   :  { %v106_v10 = vadd.f32 %v105_v8, %v29_v7  ;;  %v183_v11 = vadd.f32 %v182_v9, %v29_v7  ;;  %v217_v12 = vpop.f32.mrb[1].mxu0  ;;  %v222_v13 = vpop.f32.mrb[1].mxu1 }
  0xe1   :  { %110 = vst.msk [vmem:[#allocation2] sm:$0xf] %vm109_vm3, %v106_v10  ;;  %187 = vst.msk [vmem:[#allocation2 + $0x4] sm:$0xf] %vm109_vm3, %v183_v11 }
  0xe2   :  { %241 = shalt.err (!%p238_p4)
}
  0xe3   :  { %s242_s20 = scalar_lea.hbm %s304_s3, 128 }
  0xe4   :  { %p243_p5 = scmp.ne.s32.totalorder %s304_s3, %s242_s20  ;;  %p246_p6 = scmp.lt.u32.totalorder %s242_s20, %s304_s3 }
  0xe6   :  { %p248_p7 = pnand %p246_p6, %p243_p5 }
  0xe8   :  { %251 = shalt.err (!%p248_p7)
}
  0xe9   :  { %s258_s25 = smov 64   ;;  %s259_s26 = smov 4  }
  0xea   :  { %199 = dma.vmem_to_hbm [thread:$0]  %s194_s2, 128, %s304_s3, [#allocation3], %s258_s25, %s258_s25, %s259_s26  }
  0xeb   :  { %252 = dma.done.wait [#allocation3], 128  }
  0xec   :  { %253 = vsyncadd [#allocation3], 4294967168 }
  0xed   :  { %203 = vsyncpa [#allocation3], 1 }

</bundles_post_ra>
